<compile_context>
chip_gen: v7x
topology: tpu7x:2x2x1
jax: 0.10.0
libtpu: 0.0.40
codegen_flags: <defaults>
</compile_context>

<pallas_src>
import functools

import jax
import jax.numpy as jnp
from jax.experimental import pallas as pl
from jax.experimental.pallas import tpu as pltpu


def _round_up(x, m):
    return ((x + m - 1) // m) * m


def _round_down(x, m):
    return (x // m) * m


def _saloss_kernel(logits_ref, targets_ref, weight_ref, out_ref, acc_ref, *,
                   num_classes: int, epsilon: float, n_true: int,
                   tile_n: int, blocks_per_shard: int):
    i = pl.program_id(1)          # reduction step within this shard ("arbitrary")

    @pl.when(i == 0)
    def _init():
        acc_ref[...] = jnp.zeros_like(acc_ref)

    x = logits_ref[...].astype(jnp.float32)               # (C, T), f32 math
    c, t = x.shape

    # LogSoftmax over the class (sublane) axis, numerically stable.
    m = jnp.max(x, axis=0, keepdims=True)                 # (1, T)
    shifted = x - m
    lse = jnp.log(jnp.sum(jnp.exp(shifted), axis=0, keepdims=True))
    log_probs = shifted - lse                              # (C, T)

    # Weighted log-probs once; no one-hot / smoothed (N, C) intermediates.
    w = weight_ref[...].astype(jnp.float32)                # (C, 1) broadcast over N
    wl = w * log_probs                                     # (C, T)

    tgt = targets_ref[...]                                 # (1, T) int32
    class_ids = jax.lax.broadcasted_iota(jnp.int32, (c, t), 0)
    picked = jnp.sum(jnp.where(class_ids == tgt, wl, 0.0),
                     axis=0, keepdims=True)                # (1, T)  w[y_i]*lp[i,y_i]
    total = jnp.sum(wl, axis=0, keepdims=True)             # (1, T)  sum_j w_j*lp[i,j]

    contrib = (1.0 - epsilon) * picked + (epsilon / num_classes) * total

    # Mask padded columns (global column index >= true N).
    col0 = (pl.program_id(0) * blocks_per_shard + i) * tile_n
    lane = jax.lax.broadcasted_iota(jnp.int32, (1, t), 1)
    valid = (col0 + lane) < n_true
    acc_ref[...] += jnp.where(valid, contrib, 0.0)

    @pl.when(i == blocks_per_shard - 1)
    def _finalize():
        # Divide by the TRUE total N (not the block/shard size); 1/N is a
        # compile-time constant multiply.
        out_ref[...] = jnp.reshape(
            -jnp.sum(acc_ref[...]) * (1.0 / n_true), (1, 1, 1))


def sa_loss(logits, targets, weight, *, num_classes: int, epsilon: float,
            tile_n: int | None = None, num_shards: int = 2):
    """logits: (N, C) f32/bf16, targets: (N,) int, weight: (C,) -> scalar f32."""
    n, c = logits.shape
    if c != num_classes:
        raise ValueError(f"logits have {c} classes, expected {num_classes}")

    itemsize = jnp.dtype(logits.dtype).itemsize
    if tile_n is None:
        # Aim for ~512 KiB logits blocks (amortizes per-grid-step overhead and
        # reaches the HBM roofline) while staying tiny vs. any generation's VMEM.
        target_block_bytes = 512 * 1024
        tile_n = max(128, _round_down(max(128, target_block_bytes // (c * itemsize)), 128))
        tile_n = max(128, min(tile_n, _round_up(n, 128)))

    total_blocks = -(-n // tile_n)
    shards = num_shards if total_blocks >= num_shards else 1
    blocks_per_shard = -(-total_blocks // shards)
    n_pad = shards * blocks_per_shard * tile_n

    # Lane-dense layout: (C, N) with N on the 128-lane axis; pad N to the grid.
    logits_t = jnp.transpose(logits, (1, 0))
    if n_pad != n:
        logits_t = jnp.pad(logits_t, ((0, 0), (0, n_pad - n)))
    tgt = targets.astype(jnp.int32)
    if n_pad != n:
        tgt = jnp.pad(tgt, (0, n_pad - n))
    tgt = tgt.reshape(1, n_pad)
    w = weight.astype(jnp.float32).reshape(c, 1)

    kernel = functools.partial(
        _saloss_kernel, num_classes=num_classes, epsilon=float(epsilon),
        n_true=n, tile_n=tile_n, blocks_per_shard=blocks_per_shard)

    partials = pl.pallas_call(
        kernel,
        out_shape=jax.ShapeDtypeStruct((shards, 1, 1), jnp.float32),
        grid_spec=pltpu.PrefetchScalarGridSpec(
            num_scalar_prefetch=0,
            grid=(shards, blocks_per_shard),
            in_specs=[
                # logits (C, N_pad): lane-tiled over N
                pl.BlockSpec((c, tile_n),
                             lambda s, i: (0, s * blocks_per_shard + i)),
                # targets (1, N_pad): lane-tiled, tiny VMEM footprint per block
                pl.BlockSpec((1, tile_n),
                             lambda s, i: (0, s * blocks_per_shard + i)),
                # per-class weight (C, 1): resident across the whole grid
                pl.BlockSpec((c, 1), lambda s, i: (0, 0)),
            ],
            out_specs=pl.BlockSpec((1, 1, 1), lambda s, i: (s, 0, 0)),
            scratch_shapes=[pltpu.VMEM((1, tile_n), jnp.float32)],
        ),
        compiler_params=pltpu.CompilerParams(
            dimension_semantics=("parallel", "arbitrary"),
            vmem_limit_bytes=32 * 1024 * 1024,
        ),
    )(logits_t, tgt, w)

    return jnp.sum(partials)


def _sa_loss_ref(logits, targets, weight, *, num_classes, epsilon):
    log_probs = jax.nn.log_softmax(logits.astype(jnp.float32), axis=1)
    onehot = jax.nn.one_hot(targets, num_classes, dtype=jnp.float32)
    t = (1.0 - epsilon) * onehot + epsilon / num_classes
    t = t * weight.astype(jnp.float32).reshape(1, -1)
    return jnp.sum(jnp.mean(-t * log_probs, axis=0))


if __name__ == "__main__":
    key = jax.random.PRNGKey(0)

    # --- Test 1: small forward-implied shapes (single block, single shard) ---
    N1, C1, EPS1 = 16, 8, 0.1
    k1, k2, k3, key = jax.random.split(key, 4)
    logits1 = jax.random.normal(k1, (N1, C1), dtype=jnp.float32)
    targets1 = jax.random.randint(k2, (N1,), 0, C1, dtype=jnp.int32)
    weight1 = 0.5 + jax.random.uniform(k3, (C1,), dtype=jnp.float32)

    out1 = jax.block_until_ready(
        sa_loss(logits1, targets1, weight1, num_classes=C1, epsilon=EPS1))
    ref1 = _sa_loss_ref(logits1, targets1, weight1, num_classes=C1, epsilon=EPS1)
    if not jnp.allclose(out1, ref1, rtol=1e-5, atol=1e-5):
        raise AssertionError(f"test1 mismatch: kernel={out1} ref={ref1}")

    # --- Test 2: bf16 logits, non-multiple-of-tile N, multi-block, 2 shards ---
    N2, C2, EPS2 = 1000, 16, 0.2
    k4, k5, k6, key = jax.random.split(key, 4)
    logits2 = jax.random.normal(k4, (N2, C2), dtype=jnp.float32).astype(jnp.bfloat16)
    targets2 = jax.random.randint(k5, (N2,), 0, C2, dtype=jnp.int32)
    weight2 = 0.5 + jax.random.uniform(k6, (C2,), dtype=jnp.float32)

    out2 = jax.block_until_ready(
        sa_loss(logits2, targets2, weight2, num_classes=C2, epsilon=EPS2,
                tile_n=128, num_shards=2))
    ref2 = _sa_loss_ref(logits2, targets2, weight2, num_classes=C2, epsilon=EPS2)
    if not jnp.allclose(out2, ref2, rtol=1e-5, atol=1e-5):
        raise AssertionError(f"test2 mismatch: kernel={out2} ref={ref2}")

    print("KERNEL_OK")
</pallas_src>

<mosaic_0001>
module attributes {stable_mosaic.version = 11 : i64} {
  func.func @_saloss_kernel(%arg0: i32, %arg1: i32, %arg2: memref<8x128xf32, #tpu.memory_space<vmem>>, %arg3: memref<1x128xi32, #tpu.memory_space<vmem>>, %arg4: memref<8x1xf32, #tpu.memory_space<vmem>>, %arg5: memref<1x1x1xf32, #tpu.memory_space<vmem>>, %arg6: memref<1x128xf32, #tpu.memory_space<vmem>>) attributes {dimension_semantics = [#tpu.dimension_semantics<parallel>, #tpu.dimension_semantics<arbitrary>], iteration_bounds = array<i64: 1, 1>, scalar_prefetch = 0 : i64, scratch_operands = 1 : i64, tpu.core_type = #tpu.core_type<tc>, window_params = [{transform_indices = @transform_0, window_bounds = array<i64: 8, 128>}, {transform_indices = @transform_1, window_bounds = array<i64: 1, 128>}, {pipeline_mode = #tpu.pipeline_mode<synchronous>, transform_indices = @transform_2, window_bounds = array<i64: 8, 1>}, {transform_indices = @transform_3, window_bounds = array<i64: 1, 1, 1>}]} {
    %c0_i32 = arith.constant 0 : i32
    %0 = arith.cmpi eq, %arg1, %c0_i32 : i32
    %1 = arith.extui %0 : i1 to i32
    %c0_i32_0 = arith.constant 0 : i32
    %2 = arith.cmpi ne, %1, %c0_i32_0 : i32
    scf.if %2 {
      %cst_19 = arith.constant 0.000000e+00 : f32
      %48 = vector.broadcast %cst_19 : f32 to vector<1x128xf32>
      %c0_20 = arith.constant 0 : index
      %c0_21 = arith.constant 0 : index
      %49 = vector.load %arg6[%c0_20, %c0_21] : memref<1x128xf32, #tpu.memory_space<vmem>>, vector<1x128xf32>
      tpu.vector_store %arg6[%c0_20, %c0_21], %48 {strides = array<i32>} : memref<1x128xf32, #tpu.memory_space<vmem>>, vector<1x128xf32>,
    } else {
    }
    %c0 = arith.constant 0 : index
    %c0_1 = arith.constant 0 : index
    %3 = vector.load %arg2[%c0, %c0_1] : memref<8x128xf32, #tpu.memory_space<vmem>>, vector<8x128xf32>
    %cst = arith.constant dense<0xFF800000> : vector<128xf32>
    %4 = vector.multi_reduction <maximumf>, %3, %cst [0] : vector<8x128xf32> to vector<128xf32>
    %5 = vector.shape_cast %4 : vector<128xf32> to vector<1x128xf32>
    %6 = vector.broadcast %5 : vector<1x128xf32> to vector<8x128xf32>
    %7 = arith.subf %3, %6 : vector<8x128xf32>
    %8 = math.exp %7 : vector<8x128xf32>
    %cst_2 = arith.constant dense<0.000000e+00> : vector<128xf32>
    %9 = vector.multi_reduction <add>, %8, %cst_2 [0] : vector<8x128xf32> to vector<128xf32>
    %10 = vector.shape_cast %9 : vector<128xf32> to vector<1x128xf32>
    %11 = math.log %10 : vector<1x128xf32>
    %12 = vector.broadcast %11 : vector<1x128xf32> to vector<8x128xf32>
    %13 = arith.subf %7, %12 : vector<8x128xf32>
    %c0_3 = arith.constant 0 : index
    %c0_4 = arith.constant 0 : index
    %14 = vector.load %arg4[%c0_3, %c0_4] : memref<8x1xf32, #tpu.memory_space<vmem>>, vector<8x1xf32>
    %15 = vector.broadcast %14 : vector<8x1xf32> to vector<8x128xf32>
    %16 = arith.mulf %15, %13 : vector<8x128xf32>
    %c0_5 = arith.constant 0 : index
    %c0_6 = arith.constant 0 : index
    %17 = vector.load %arg3[%c0_5, %c0_6] : memref<1x128xi32, #tpu.memory_space<vmem>>, vector<1x128xi32>
    %18 = tpu.iota {dimensions = array<i32: 0>} : vector<8x128xi32>
    %19 = vector.broadcast %17 : vector<1x128xi32> to vector<8x128xi32>
    %20 = arith.cmpi eq, %18, %19 : vector<8x128xi32>
    %cst_7 = arith.constant 0.000000e+00 : f32
    %21 = vector.broadcast %cst_7 : f32 to vector<8x128xf32>
    %22 = arith.select %20, %16, %21 : vector<8x128xi1>, vector<8x128xf32>
    %cst_8 = arith.constant dense<0.000000e+00> : vector<128xf32>
    %23 = vector.multi_reduction <add>, %22, %cst_8 [0] : vector<8x128xf32> to vector<128xf32>
    %24 = vector.shape_cast %23 : vector<128xf32> to vector<1x128xf32>
    %cst_9 = arith.constant dense<0.000000e+00> : vector<128xf32>
    %25 = vector.multi_reduction <add>, %16, %cst_9 [0] : vector<8x128xf32> to vector<128xf32>
    %26 = vector.shape_cast %25 : vector<128xf32> to vector<1x128xf32>
    %cst_10 = arith.constant 0.899999976 : f32
    %27 = vector.broadcast %cst_10 : f32 to vector<1x128xf32>
    %28 = arith.mulf %27, %24 : vector<1x128xf32>
    %cst_11 = arith.constant 1.250000e-02 : f32
    %29 = vector.broadcast %cst_11 : f32 to vector<1x128xf32>
    %30 = arith.mulf %29, %26 : vector<1x128xf32>
    %31 = arith.addf %28, %30 : vector<1x128xf32>
    %c1_i32 = arith.constant 1 : i32
    %32 = arith.muli %arg0, %c1_i32 : i32
    %33 = arith.addi %32, %arg1 : i32
    %c128_i32 = arith.constant 128 : i32
    %34 = arith.muli %33, %c128_i32 : i32
    %35 = tpu.iota {dimensions = array<i32: 1>} : vector<1x128xi32>
    %36 = vector.broadcast %34 : i32 to vector<1x128xi32>
    %37 = arith.addi %36, %35 : vector<1x128xi32>
    %c16_i32 = arith.constant 16 : i32
    %38 = vector.broadcast %c16_i32 : i32 to vector<1x128xi32>
    %39 = arith.cmpi slt, %37, %38 : vector<1x128xi32>
    %c0_12 = arith.constant 0 : index
    %c0_13 = arith.constant 0 : index
    %40 = vector.load %arg6[%c0_12, %c0_13] : memref<1x128xf32, #tpu.memory_space<vmem>>, vector<1x128xf32>
    %cst_14 = arith.constant 0.000000e+00 : f32
    %41 = vector.broadcast %cst_14 : f32 to vector<1x128xf32>
    %42 = arith.select %39, %31, %41 : vector<1x128xi1>, vector<1x128xf32>
    %43 = arith.addf %40, %42 : vector<1x128xf32>
    %c0_15 = arith.constant 0 : index
    %c0_16 = arith.constant 0 : index
    %44 = vector.load %arg6[%c0_15, %c0_16] : memref<1x128xf32, #tpu.memory_space<vmem>>, vector<1x128xf32>
    tpu.vector_store %arg6[%c0_15, %c0_16], %43 {strides = array<i32>} : memref<1x128xf32, #tpu.memory_space<vmem>>, vector<1x128xf32>,
    %c0_i32_17 = arith.constant 0 : i32
    %45 = arith.cmpi eq, %arg1, %c0_i32_17 : i32
    %46 = arith.extui %45 : i1 to i32
    %c0_i32_18 = arith.constant 0 : i32
    %47 = arith.cmpi ne, %46, %c0_i32_18 : i32
    scf.if %47 {
      %c0_19 = arith.constant 0 : index
      %c0_20 = arith.constant 0 : index
      %48 = vector.load %arg6[%c0_19, %c0_20] : memref<1x128xf32, #tpu.memory_space<vmem>>, vector<1x128xf32>
      %49 = vector.shape_cast %48 : vector<1x128xf32> to vector<1x1x128xf32>
      %cst_21 = arith.constant dense<0.000000e+00> : vector<1xf32>
      %50 = vector.multi_reduction <add>, %49, %cst_21 [1, 2] : vector<1x1x128xf32> to vector<1xf32>
      %51 = vector.shape_cast %50 : vector<1xf32> to vector<1x1x1xf32>
      %52 = vector.extract %51[0, 0, 0] : f32 from vector<1x1x1xf32>
      %cst_22 = arith.constant 0.000000e+00 : f32
      %53 = arith.subf %cst_22, %52 : f32
      %cst_23 = arith.constant 6.250000e-02 : f32
      %54 = arith.mulf %53, %cst_23 : f32
      %55 = vector.broadcast %54 : f32 to vector<1x1x1xf32>
      %c0_24 = arith.constant 0 : index
      %c0_25 = arith.constant 0 : index
      %c0_26 = arith.constant 0 : index
      %56 = vector.load %arg5[%c0_24, %c0_25, %c0_26] : memref<1x1x1xf32, #tpu.memory_space<vmem>>, vector<1x1x1xf32>
      tpu.vector_store %arg5[%c0_24, %c0_25, %c0_26], %55 {strides = array<i32>} : memref<1x1x1xf32, #tpu.memory_space<vmem>>, vector<1x1x1xf32>,
    } else {
    }
    return
  }
  func.func @transform_0(%arg0: i32, %arg1: i32) -> (i32, i32) {
    %c1_i32 = arith.constant 1 : i32
    %0 = arith.muli %arg0, %c1_i32 : i32
    %1 = arith.addi %0, %arg1 : i32
    %c0_i32 = arith.constant 0 : i32
    %c0_i32_0 = arith.constant 0 : i32
    return %c0_i32, %1 : i32, i32
  }
  func.func @transform_1(%arg0: i32, %arg1: i32) -> (i32, i32) {
    %c1_i32 = arith.constant 1 : i32
    %0 = arith.muli %arg0, %c1_i32 : i32
    %1 = arith.addi %0, %arg1 : i32
    %c0_i32 = arith.constant 0 : i32
    %c0_i32_0 = arith.constant 0 : i32
    return %c0_i32, %1 : i32, i32
  }
  func.func @transform_2(%arg0: i32, %arg1: i32) -> (i32, i32) {
    %c0_i32 = arith.constant 0 : i32
    %c0_i32_0 = arith.constant 0 : i32
    %c0_i32_1 = arith.constant 0 : i32
    return %c0_i32, %c0_i32_0 : i32, i32
  }
  func.func @transform_3(%arg0: i32, %arg1: i32) -> (i32, i32, i32) {
    %c0_i32 = arith.constant 0 : i32
    %c0_i32_0 = arith.constant 0 : i32
    %c0_i32_1 = arith.constant 0 : i32
    return %arg0, %c0_i32, %c0_i32_0 : i32, i32, i32
  }
}

</mosaic_0001>

<bundles_post_ra>
// kernel: tpu_custom_call.1
= control target key start
LH: loop header
LB: loop body
LE: loop exit
PB: predicated region body
PF: predicated region fallthrough
CT: control target
= control target key end

     0   :  { %v190_v1 = vmov 0   ;;  %s234_s0 = inlined_call_operand.vmem [shape: f32[8,128], index: 0, kind: input, shape index: {}]   ;;  %s235_s1 = inlined_call_operand.vmem [shape: s32[1,128], index: 1, kind: input, shape index: {}]   ;;  %s236_s2 = inlined_call_operand.vmem [shape: f32[8,1], index: 2, kind: input, shape index: {}]   ;;  %s237_s3 = inlined_call_operand.hbm [shape: f32[1,1,1], index: 3, kind: output, shape index: {}]  }
   0x1   :  { %v70_v0 = vld [vmem:[%s236_s2] sm:$0xff]  ;;  %161 = vset.pattern.permute.xlu0 %v190_v1 }
   0x2   :  { %8 = vsyncpa [#allocation4], 0  ;;  %73 = vperm.xlu0 %161, %v70_v0   ;;  %v191_v2 = vmov 0.0   ;;  %v51_v3 = vld [vmem:[%s234_s0] sm:$0xff]  ;;  %v78_v20 = vlaneseq  ;;  %vm116_vm2 = vcmask 1040384   ;;  %s192_s17 = smov [#allocation3]  }
   0x3   :  { %50 = vst [vmem:[#allocation2] sm:$0x1] %v191_v2  ;;  %v52_v4 = vrot.slane %v51_v3, 4  ;;  %v155_v23 = vld [vmem:[%s235_s1] ss:$0 sm:$0xff]  ;;  %s138_s18 = sshll.u32 %s192_s17, 4  ;;  %s139_s18 = int_to_ptr.vmem [resolvable:$true] %s138_s18 }
   0x4   :  { %v79_v22 = vshrl.u32 %v78_v20, 7  ;;  %v104_v38 = vand.u32 127, %v78_v20  ;;  %vm130_vm3 = vcmask 0   ;;  %s166_s20 = scalar_lea.vmem %s139_s18, 16  ;;  %s170_s21 = scalar_lea.vmem %s139_s18, 32 }
   0x5   :  { %v53_v5 = vmax.f32 %v51_v3, %v52_v4  ;;  %p167_p0 = scmp.ne.s32.totalorder %s139_s18, %s166_s20  ;;  %p171_p1 = scmp.lt.s32.totalorder %s139_s18, %s139_s18 }
   0x6   :  { %vm84_vm0 = vcmp.eq.s32.totalorder %v79_v22, %v155_v23  ;;  %vm107_vm1 = vcmp.lt.s32.totalorder %v104_v38, 16  ;;  %p172_p2 = scmp.lt.s32.totalorder %s170_s21, %s166_s20 }
   0x7   :  { %v54_v6 = vrot.slane %v53_v5, 2 }
   0x8   :  { %p173_p3 = por %p172_p2, %p171_p1 }
   0x9   :  { %v55_v7 = vmax.f32 %v53_v5, %v54_v6 }
   0xa   :  { %v108_v44 = vld [vmem:[#allocation2] sm:$0x1]  ;;  %p174_p4 = pnand %p173_p3, %p167_p0 }
   0xb   :  { %v56_v8 = vrot.slane %v55_v7, 1 }
   0xd   :  { %v57_v9 = vmax.f32 %v55_v7, %v56_v8 }
   0xf   :  { %v58_v10 = vsub.f32 %v51_v3, %v57_v9 }
  0x11   :  { %v59_v11 = vmul.f32 1.442695, %v58_v10 }
  0x13   :  { %162 = vpow2.f32 %v59_v11 }
  0x1d   :  { %v163_v12 = vpop.eup %162 }
  0x1e   :  { %v61_v13 = vrot.slane %v163_v12, 4 }
  0x20   :  { %v62_v14 = vadd.f32 %v163_v12, %v61_v13 }
  0x22   :  { %v63_v15 = vrot.slane %v62_v14, 2 }
  0x24   :  { %v64_v16 = vadd.f32 %v63_v15, %v62_v14 }
  0x26   :  { %v65_v17 = vrot.slane %v64_v16, 1 }
  0x28   :  { %v66_v18 = vadd.f32 %v65_v17, %v64_v16 }
  0x2a   :  { %164 = vlog2.f32 %v66_v18 }
  0x34   :  { %v165_v19 = vpop.eup %164 }
  0x35   :  { %v68_v21 = vmul.f32 0.6931472, %v165_v19 }
  0x37   :  { %v69_v24 = vsub.f32 %v58_v10, %v68_v21 }
  0x81   :  { %v74_v25 = vpop.permute.xlu0 %73 }
  0x82   :  { %v76_v26 = vmul.f32 %v74_v25, %v69_v24 }
  0x84   :  { %v85_v27 = vsel %vm84_vm0, %v76_v26, 0.0  ;;  %v92_v28 = vrot.slane %v76_v26, 4 }
  0x85   :  { %v86_v29 = vrot.slane %v85_v27, 4 }
  0x86   :  { %v93_v30 = vadd.f32 %v92_v28, %v76_v26 }
  0x87   :  { %v87_v31 = vadd.f32 %v86_v29, %v85_v27 }
  0x88   :  { %v94_v32 = vrot.slane %v93_v30, 2 }
  0x89   :  { %v88_v33 = vrot.slane %v87_v31, 2 }
  0x8a   :  { %v95_v34 = vadd.f32 %v94_v32, %v93_v30 }
  0x8b   :  { %v89_v35 = vadd.f32 %v88_v33, %v87_v31 }
  0x8c   :  { %v96_v36 = vrot.slane %v95_v34, 1 }
  0x8d   :  { %v90_v37 = vrot.slane %v89_v35, 1 }
  0x8e   :  { %v97_v39 = vadd.f32 %v96_v36, %v95_v34 }
  0x8f   :  { %v91_v40 = vadd.f32 %v90_v37, %v89_v35 }
  0x90   :  { %v99_v41 = vmul.f32 0.0125, %v97_v39 }
  0x91   :  { %v98_v42 = vmul.f32 0.9, %v91_v40 }
  0x93   :  { %v100_v43 = vadd.f32 %v99_v41, %v98_v42 }
  0x95   :  { %v109_v45 = vsel %vm107_vm1, %v100_v43, 0.0 }
  0x96   :  { %v110_v46 = vadd.f32 %v109_v45, %v108_v44 }
  0x98   :  { %111 = vst [vmem:[#allocation2] sm:$0x1] %v110_v46 }
  0x9f   :  { %v115_v47 = vld [vmem:[#allocation2] sm:$0x1] }
  0xa0   :  { %v117_v48 = vsel %vm116_vm2, %v115_v47, 0.0 }
  0xa1   :  { %118 = vadd.xlane.f32.xlu0 %v117_v48 }
 0x12e   :  { %v119_v49 = vpop.xlane.xlu0 %118 }
 0x12f   :  { %v120_v50 = vrot.slane %v119_v49, 4 }
 0x131   :  { %v121_v51 = vadd.f32 %v120_v50, %v119_v49 }
 0x133   :  { %v122_v52 = vrot.slane %v121_v51, 2 }
 0x135   :  { %v123_v53 = vadd.f32 %v122_v52, %v121_v51 }
 0x137   :  { %v124_v54 = vrot.slane %v123_v53, 1 }
 0x139   :  { %v125_v55 = vadd.f32 %v124_v54, %v123_v53 }
 0x13b   :  { %156 = vpush %v125_v55 }
 0x16c   :  { %s157_s1 = spop %156 }
 0x16d   :  { %s127_s16 = ssub.f32 0.0, %s157_s1 }
 0x16f   :  { %s128_s19 = smul.f32 0.0625, %s127_s16 }
 0x171   :  { %v129_v56 = vstv %s128_s19 }
 0x172   :  { %131 = vst.msk [vmem:[#allocation3] sm:$0x1] %vm130_vm3, %v129_v56 }
 0x173   :  { %177 = shalt.err (!%p174_p4)
}
 0x174   :  { %s178_s24 = scalar_lea.hbm %s237_s3, 16 }
 0x175   :  { %p179_p5 = scmp.ne.s32.totalorder %s237_s3, %s178_s24  ;;  %p182_p6 = scmp.lt.u32.totalorder %s178_s24, %s237_s3 }
 0x177   :  { %p184_p7 = pnand %p182_p6, %p179_p5 }
 0x179   :  { %187 = shalt.err (!%p184_p7)
}
 0x17a   :  { %141 = dma.vmem_to_hbm [thread:$0]  %s139_s18, 16, %s237_s3, [#allocation4]  }
 0x17b   :  { %188 = dma.done.wait [#allocation4], 16  }
 0x17c   :  { %189 = vsyncadd [#allocation4], 4294967280 }
 0x17d   :  { %145 = vsyncpa [#allocation4], 1 }

</bundles_post_ra>
